<compile_context>
chip_gen: v7x
topology: tpu7x:2x2x1
jax: 0.10.0
libtpu: 0.0.40
codegen_flags: <defaults>
</compile_context>

<pallas_src>
import functools

import jax
import jax.numpy as jnp
from jax.experimental import pallas as pl
from jax.experimental.pallas import tpu as pltpu


def _round_up(n, m):
    return ((n + m - 1) // m) * m


def _pad_tokens(x2d, tm):
    n = x2d.shape[0]
    pad = _round_up(n, tm) - n
    if pad:
        x2d = jnp.pad(x2d, ((0, pad), (0, 0)))
    return x2d


# --------------------------------------------------------------- Linear ------
def _linear_kernel(x_ref, w_ref, b_ref, o_ref):
    y = jnp.dot(x_ref[...], w_ref[...], preferred_element_type=jnp.float32)
    o_ref[...] = (y + b_ref[...]).astype(o_ref.dtype)


def linear(x2d, w, b, *, tm=256):
    """x2d: [n_tok, d_in]; w: [d_out, d_in]; b: [d_out]  (PyTorch nn.Linear)."""
    n_tok, d_in = x2d.shape
    d_out = w.shape[0]
    assert tm % 8 == 0
    xp = _pad_tokens(x2d, tm)
    n_pad = xp.shape[0]
    w_t = w.T.astype(x2d.dtype)                 # [d_in, d_out]
    b2 = b.reshape(1, d_out).astype(jnp.float32)

    itemsize = x2d.dtype.itemsize
    cost = pl.CostEstimate(
        flops=2 * n_pad * d_in * d_out,
        transcendentals=0,
        bytes_accessed=(n_pad * d_in + d_in * d_out + d_out + n_pad * d_out)
        * itemsize,
    )
    out = pl.pallas_call(
        _linear_kernel,
        out_shape=jax.ShapeDtypeStruct((n_pad, d_out), x2d.dtype),
        grid_spec=pltpu.PrefetchScalarGridSpec(
            num_scalar_prefetch=0,
            grid=(n_pad // tm,),
            in_specs=[
                pl.BlockSpec((tm, d_in), lambda i: (i, 0)),       # x tile
                pl.BlockSpec((d_in, d_out), lambda i: (0, 0)),    # W^T (full)
                pl.BlockSpec((1, d_out), lambda i: (0, 0)),       # bias
            ],
            out_specs=pl.BlockSpec((tm, d_out), lambda i: (i, 0)),
        ),
        compiler_params=pltpu.CompilerParams(dimension_semantics=("parallel",)),
        cost_estimate=cost,
    )(xp, w_t, b2)
    return out[:n_tok]


# ------------------------------------------------------- Multi-head attn -----
def _mha_kernel(q_ref, k_ref, v_ref, m_ref, o_ref, *, scale):
    q = q_ref[...]              # (S, d_k)
    k = k_ref[...]              # (S, d_k)
    v = v_ref[...]              # (S, d_k)
    # scores = (Q @ K^T) * scale, f32 accumulation on the MXU (trans_b form).
    s = jax.lax.dot_general(
        q, k, (((1,), (1,)), ((), ())), preferred_element_type=jnp.float32
    ) * scale
    s = jnp.where(m_ref[...] == 0, -1e9, s)
    s_max = jnp.max(s, axis=-1, keepdims=True)
    p = jnp.exp(s - s_max)
    denom = jnp.sum(p, axis=-1, keepdims=True)
    attn = p / denom
    o = jnp.dot(attn.astype(v.dtype), v, preferred_element_type=jnp.float32)
    o_ref[...] = o.astype(o_ref.dtype)


def mha_attention(q, k, v, mask, *, scale):
    """q/k/v: [B, H, S, d_k]; mask: [B, S, S] (0 = masked key)."""
    B, H, S, d_k = q.shape
    kernel = functools.partial(_mha_kernel, scale=scale)
    return pl.pallas_call(
        kernel,
        out_shape=jax.ShapeDtypeStruct((B, H, S, d_k), q.dtype),
        grid_spec=pltpu.PrefetchScalarGridSpec(
            num_scalar_prefetch=0,
            grid=(B, H),
            in_specs=[
                pl.BlockSpec((None, None, S, d_k), lambda b, h: (b, h, 0, 0)),
                pl.BlockSpec((None, None, S, d_k), lambda b, h: (b, h, 0, 0)),
                pl.BlockSpec((None, None, S, d_k), lambda b, h: (b, h, 0, 0)),
                pl.BlockSpec((None, S, S), lambda b, h: (b, 0, 0)),
            ],
            out_specs=pl.BlockSpec((None, None, S, d_k),
                                   lambda b, h: (b, h, 0, 0)),
        ),
        compiler_params=pltpu.CompilerParams(
            dimension_semantics=("parallel", "parallel")),
    )(q, k, v, mask)


# ----------------------------------------------------- Residual + LayerNorm --
def _add_ln_kernel(x_ref, y_ref, g_ref, b_ref, o_ref, *, eps):
    z = x_ref[...].astype(jnp.float32) + y_ref[...].astype(jnp.float32)
    mu = jnp.mean(z, axis=-1, keepdims=True)
    zc = z - mu
    var = jnp.mean(zc * zc, axis=-1, keepdims=True)
    inv = jax.lax.rsqrt(var + eps)
    o_ref[...] = (zc * inv * g_ref[...] + b_ref[...]).astype(o_ref.dtype)


def add_layernorm(x2d, y2d, gamma, beta, *, tm=256, eps=1e-5):
    n_tok, d = x2d.shape
    xp = _pad_tokens(x2d, tm)
    yp = _pad_tokens(y2d, tm)
    n_pad = xp.shape[0]
    g2 = gamma.reshape(1, d).astype(jnp.float32)
    b2 = beta.reshape(1, d).astype(jnp.float32)
    kernel = functools.partial(_add_ln_kernel, eps=eps)
    out = pl.pallas_call(
        kernel,
        out_shape=jax.ShapeDtypeStruct((n_pad, d), x2d.dtype),
        grid_spec=pltpu.PrefetchScalarGridSpec(
            num_scalar_prefetch=0,
            grid=(n_pad // tm,),
            in_specs=[
                pl.BlockSpec((tm, d), lambda i: (i, 0)),
                pl.BlockSpec((tm, d), lambda i: (i, 0)),
                pl.BlockSpec((1, d), lambda i: (0, 0)),
                pl.BlockSpec((1, d), lambda i: (0, 0)),
            ],
            out_specs=pl.BlockSpec((tm, d), lambda i: (i, 0)),
        ),
        compiler_params=pltpu.CompilerParams(dimension_semantics=("parallel",)),
    )(xp, yp, g2, b2)
    return out[:n_tok]


# ---------------------------------------------------- Positionwise FFN -------
def _ffn_kernel(x_ref, w1_ref, b1_ref, w2_ref, b2_ref, o_ref, acc_ref):
    k = pl.program_id(1)

    @pl.when(k == 0)
    def _():
        acc_ref[...] = jnp.zeros_like(acc_ref)

    h = jnp.dot(x_ref[...], w1_ref[...], preferred_element_type=jnp.float32)
    h = jnp.maximum(h + b1_ref[...], 0.0)           # bias + ReLU in f32 (VPU)
    acc_ref[...] += jnp.dot(h.astype(x_ref.dtype), w2_ref[...],
                            preferred_element_type=jnp.float32)

    @pl.when(k == pl.num_programs(1) - 1)
    def _():
        o_ref[...] = (acc_ref[...] + b2_ref[...]).astype(o_ref.dtype)


def positionwise_ffn(x2d, w1, b1, w2, b2, *, tm=256, t_ff=512):
    """x2d: [n_tok, d_model]; w1: [d_ff, d_model]; w2: [d_model, d_ff]."""
    n_tok, d_model = x2d.shape
    d_ff = w1.shape[0]
    t_ff = min(t_ff, d_ff)
    assert tm % 8 == 0 and d_ff % t_ff == 0

    xp = _pad_tokens(x2d, tm)
    n_pad = xp.shape[0]
    w1_t = w1.T.astype(x2d.dtype)                    # [d_model, d_ff]
    w2_t = w2.T.astype(x2d.dtype)                    # [d_ff, d_model]
    b1_2 = b1.reshape(1, d_ff).astype(jnp.float32)
    b2_2 = b2.reshape(1, d_model).astype(jnp.float32)

    itemsize = x2d.dtype.itemsize
    # Double-buffered tiles + f32 accumulator, plus 2x slack.
    vmem_est = (2 * (tm * d_model + d_model * t_ff + t_ff + t_ff * d_model
                     + d_model + tm * d_model) * itemsize
                + tm * d_model * 4)
    vmem_limit = int(min(max(2 * vmem_est, 16 * 1024 * 1024), 64 * 1024 * 1024))

    cost = pl.CostEstimate(
        flops=4 * n_pad * d_model * d_ff,
        transcendentals=0,
        bytes_accessed=(2 * n_pad * d_model + 2 * d_model * d_ff
                        + d_ff + d_model) * itemsize,
    )

    out = pl.pallas_call(
        _ffn_kernel,
        out_shape=jax.ShapeDtypeStruct((n_pad, d_model), x2d.dtype),
        grid_spec=pltpu.PrefetchScalarGridSpec(
            num_scalar_prefetch=0,
            grid=(n_pad // tm, d_ff // t_ff),
            in_specs=[
                pl.BlockSpec((tm, d_model), lambda i, k: (i, 0)),     # x tile
                pl.BlockSpec((d_model, t_ff), lambda i, k: (0, k)),   # W1^T cols
                pl.BlockSpec((1, t_ff), lambda i, k: (0, k)),         # b1 slice
                pl.BlockSpec((t_ff, d_model), lambda i, k: (k, 0)),   # W2^T rows
                pl.BlockSpec((1, d_model), lambda i, k: (0, 0)),      # b2
            ],
            out_specs=pl.BlockSpec((tm, d_model), lambda i, k: (i, 0)),
            scratch_shapes=[pltpu.VMEM((tm, d_model), jnp.float32)],
        ),
        compiler_params=pltpu.CompilerParams(
            dimension_semantics=("parallel", "arbitrary"),
            vmem_limit_bytes=vmem_limit,
        ),
        cost_estimate=cost,
    )(xp, w1_t, b1_2, w2_t, b2_2)
    return out[:n_tok]


# ------------------------------------------------------------ EncoderLayer ---
def encoder_layer(x, mask, params, *, tm=256, t_ff=512, compute_dtype=None):
    """x: [B, S, d_model]; mask: [B, S, S] with 0 = masked position (or None).

    compute_dtype: cast activations/weights for the matmuls (e.g. jnp.bfloat16
    on v6e/v7x); accumulation, softmax, ReLU and LayerNorm stats stay in f32.
    """
    B, S, d_model = x.shape
    H = params["num_heads"]
    d_k = d_model // H
    if mask is None:
        mask = jnp.ones((B, S, S), jnp.float32)
    if compute_dtype is not None:
        x = x.astype(compute_dtype)
        params = {k_: (v.astype(compute_dtype) if hasattr(v, "astype") else v)
                  for k_, v in params.items()}
    x2d = x.reshape(B * S, d_model)

    # Fused QKV projection (stream x through the MXU once).
    w_qkv = jnp.concatenate([params["wq"], params["wk"], params["wv"]], axis=0)
    b_qkv = jnp.concatenate([params["bq"], params["bk"], params["bv"]], axis=0)
    qkv = linear(x2d, w_qkv, b_qkv, tm=tm)
    q, k, v = jnp.split(qkv, 3, axis=-1)

    def to_heads(t):
        return t.reshape(B, S, H, d_k).transpose(0, 2, 1, 3)

    attn = mha_attention(to_heads(q), to_heads(k), to_heads(v),
                         mask.astype(jnp.float32), scale=1.0 / (d_k ** 0.5))
    attn = attn.transpose(0, 2, 1, 3).reshape(B * S, d_model)
    attn_out = linear(attn, params["wo"], params["bo"], tm=tm)

    x1 = add_layernorm(x2d, attn_out, params["g1"], params["be1"], tm=tm)
    ff = positionwise_ffn(x1, params["w1"], params["b1"],
                          params["w2"], params["b2"], tm=tm, t_ff=t_ff)
    x2 = add_layernorm(x1, ff, params["g2"], params["be2"], tm=tm)
    return x2.reshape(B, S, d_model)


# ----------------------------------------------------------- Reference -------
def ref_encoder_layer(x, mask, p):
    B, S, d_model = x.shape
    H = p["num_heads"]
    d_k = d_model // H

    def lin(t, w, b):
        return t @ w.T + b

    def split_heads(t):
        return t.reshape(B, S, H, d_k).transpose(0, 2, 1, 3)

    q = split_heads(lin(x, p["wq"], p["bq"]))
    k = split_heads(lin(x, p["wk"], p["bk"]))
    v = split_heads(lin(x, p["wv"], p["bv"]))
    scores = jnp.einsum("bhqd,bhkd->bhqk", q, k) / jnp.sqrt(jnp.float32(d_k))
    scores = jnp.where(mask[:, None, :, :] == 0, -1e9, scores)
    attn = jax.nn.softmax(scores, axis=-1)
    out = jnp.einsum("bhqk,bhkd->bhqd", attn, v)
    out = out.transpose(0, 2, 1, 3).reshape(B, S, d_model)
    attn_out = lin(out, p["wo"], p["bo"])

    def ln(z, g, b, eps=1e-5):
        mu = z.mean(-1, keepdims=True)
        var = ((z - mu) ** 2).mean(-1, keepdims=True)
        return (z - mu) * jax.lax.rsqrt(var + eps) * g + b

    x1 = ln(x + attn_out, p["g1"], p["be1"])
    ff = lin(jnp.maximum(lin(x1, p["w1"], p["b1"]), 0.0), p["w2"], p["b2"])
    return ln(x1 + ff, p["g2"], p["be2"])


if __name__ == "__main__":
    # Small but lane-dense shapes: batch=2, seq=64, d_model=128, heads=4, d_ff=256.
    B, S, d_model, H, d_ff = 2, 64, 128, 4, 256
    key = jax.random.PRNGKey(0)
    ks = jax.random.split(key, 17)

    def lin_init(kw, kb, d_out, d_in):
        bound = 1.0 / (d_in ** 0.5)
        w = jax.random.uniform(kw, (d_out, d_in), jnp.float32, -bound, bound)
        b = jax.random.uniform(kb, (d_out,), jnp.float32, -bound, bound)
        return w, b

    wq, bq = lin_init(ks[0], ks[1], d_model, d_model)
    wk, bk = lin_init(ks[2], ks[3], d_model, d_model)
    wv, bv = lin_init(ks[4], ks[5], d_model, d_model)
    wo, bo = lin_init(ks[6], ks[7], d_model, d_model)
    w1, b1 = lin_init(ks[8], ks[9], d_ff, d_model)
    w2, b2 = lin_init(ks[10], ks[11], d_model, d_ff)
    g1 = 1.0 + 0.1 * jax.random.normal(ks[12], (d_model,), jnp.float32)
    be1 = 0.1 * jax.random.normal(ks[13], (d_model,), jnp.float32)
    g2 = 1.0 + 0.1 * jax.random.normal(ks[14], (d_model,), jnp.float32)
    be2 = 0.1 * jax.random.normal(ks[15], (d_model,), jnp.float32)

    params = dict(num_heads=H, wq=wq, bq=bq, wk=wk, bk=bk, wv=wv, bv=bv,
                  wo=wo, bo=bo, w1=w1, b1=b1, w2=w2, b2=b2,
                  g1=g1, be1=be1, g2=g2, be2=be2)

    x = jax.random.normal(ks[16], (B, S, d_model), jnp.float32)
    # Padding-style mask: batch 0 sees every key, batch 1 masks the last 16 keys.
    key_valid = jnp.arange(S)[None, :] < jnp.array([S, S - 16])[:, None]   # [B, S]
    mask = jnp.broadcast_to(key_valid[:, None, :], (B, S, S)).astype(jnp.float32)

    # tm=64 / t_ff=128 keep every grid > 1 at these small demo shapes;
    # production defaults are tm=256, t_ff=512 (and compute_dtype=bf16 on v6e/v7x).
    y = encoder_layer(x, mask, params, tm=64, t_ff=128)
    jax.block_until_ready(y)

    ref = ref_encoder_layer(x, mask, params)
    assert y.shape == (B, S, d_model)
    max_err = float(jnp.max(jnp.abs(y - ref)))
    assert jnp.allclose(y, ref, atol=1e-2, rtol=1e-2), f"max abs err = {max_err}"

    print("KERNEL_OK")
</pallas_src>

<mosaic_0001>
module attributes {stable_mosaic.version = 11 : i64} {
  func.func @_linear_kernel(%arg0: i32, %arg1: memref<64x128xf32, #tpu.memory_space<vmem>>, %arg2: memref<128x384xf32, #tpu.memory_space<vmem>>, %arg3: memref<1x384xf32, #tpu.memory_space<vmem>>, %arg4: memref<64x384xf32, #tpu.memory_space<vmem>>) attributes {dimension_semantics = [#tpu.dimension_semantics<parallel>], iteration_bounds = array<i64: 2>, scalar_prefetch = 0 : i64, scratch_operands = 0 : i64, tpu.core_type = #tpu.core_type<tc>, window_params = [{transform_indices = @transform_0, window_bounds = array<i64: 64, 128>}, {pipeline_mode = #tpu.pipeline_mode<synchronous>, transform_indices = @transform_1, window_bounds = array<i64: 128, 384>}, {pipeline_mode = #tpu.pipeline_mode<synchronous>, transform_indices = @transform_2, window_bounds = array<i64: 1, 384>}, {transform_indices = @transform_3, window_bounds = array<i64: 64, 384>}]} {
    %c0 = arith.constant 0 : index
    %c0_0 = arith.constant 0 : index
    %0 = vector.load %arg1[%c0, %c0_0] : memref<64x128xf32, #tpu.memory_space<vmem>>, vector<64x128xf32>
    %c0_1 = arith.constant 0 : index
    %c0_2 = arith.constant 0 : index
    %1 = vector.load %arg2[%c0_1, %c0_2] : memref<128x384xf32, #tpu.memory_space<vmem>>, vector<128x384xf32>
    %cst = arith.constant dense<0.000000e+00> : vector<64x384xf32>
    %2 = tpu.matmul %0, %1, %cst {dimension_numbers = #tpu.dot_dimension_numbers<[1], [0], [0], [1], [0, 0, 1, 1], [], []>} : vector<64x128xf32>, vector<128x384xf32>, vector<64x384xf32> -> vector<64x384xf32>
    %c0_3 = arith.constant 0 : index
    %c0_4 = arith.constant 0 : index
    %3 = vector.load %arg3[%c0_3, %c0_4] : memref<1x384xf32, #tpu.memory_space<vmem>>, vector<1x384xf32>
    %4 = vector.broadcast %3 : vector<1x384xf32> to vector<64x384xf32>
    %5 = arith.addf %2, %4 : vector<64x384xf32>
    %c0_5 = arith.constant 0 : index
    %c0_6 = arith.constant 0 : index
    %6 = vector.load %arg4[%c0_5, %c0_6] : memref<64x384xf32, #tpu.memory_space<vmem>>, vector<64x384xf32>
    tpu.vector_store %arg4[%c0_5, %c0_6], %5 {strides = array<i32>} : memref<64x384xf32, #tpu.memory_space<vmem>>, vector<64x384xf32>,
    return
  }
  func.func @transform_0(%arg0: i32) -> (i32, i32) {
    %c0_i32 = arith.constant 0 : i32
    %c0_i32_0 = arith.constant 0 : i32
    return %arg0, %c0_i32 : i32, i32
  }
  func.func @transform_1(%arg0: i32) -> (i32, i32) {
    %c0_i32 = arith.constant 0 : i32
    %c0_i32_0 = arith.constant 0 : i32
    %c0_i32_1 = arith.constant 0 : i32
    return %c0_i32, %c0_i32_0 : i32, i32
  }
  func.func @transform_2(%arg0: i32) -> (i32, i32) {
    %c0_i32 = arith.constant 0 : i32
    %c0_i32_0 = arith.constant 0 : i32
    %c0_i32_1 = arith.constant 0 : i32
    return %c0_i32, %c0_i32_0 : i32, i32
  }
  func.func @transform_3(%arg0: i32) -> (i32, i32) {
    %c0_i32 = arith.constant 0 : i32
    %c0_i32_0 = arith.constant 0 : i32
    return %arg0, %c0_i32 : i32, i32
  }
}

</mosaic_0001>

<bundles_post_ra>
// kernel: tpu_custom_call.1
= control target key start
LH: loop header
LB: loop body
LE: loop exit
PB: predicated region body
PF: predicated region fallthrough
CT: control target
= control target key end

     0   :  { %8 = vsyncpa [#allocation3], 0  ;;  %s1263_s0 = inlined_call_operand.hbm [shape: f32[128,128], index: 0, kind: input, shape index: {}]   ;;  %s1264_s1 = inlined_call_operand.hbm [shape: f32[128,384], index: 1, kind: input, shape index: {}]   ;;  %s1265_s2 = inlined_call_operand.vmem [shape: f32[1,384], index: 2, kind: input, shape index: {}]   ;;  %s1266_s3 = inlined_call_operand.hbm [shape: f32[128,384], index: 3, kind: output, shape index: {}]  }
   0x1   :  { %10 = vsyncpa [#allocation3 + $0x1], 0 }
   0x2   :  { %11 = vsyncpa [#allocation6], 0 }
   0x3   :  { %12 = vsyncpa [#allocation4], 0 }
   0x4   :  { %14 = vsyncpa [#allocation4 + $0x1], 0  ;;  %s993_s12 = smov 0   ;;  %s995_s13 = smov 0  }
   0x5   :  { %s997_s14 = smov 0   ;;  %s999_s15 = smov 0  }
   0x6 LB: > { %s1014_s16 = sadd.s32 4294967295, %s961_s15   ;;  %s619_s17 = sadd.s32 4294967294, %s961_s15   ;;  %s961_s15 = sphi %s999_s15, %s1286_s15   ;;  %s957_s14 = sphi %s997_s14, %s1285_s14   ;;  %s953_s13 = sphi %s995_s13, %s1284_s13   ;;  %s949_s12 = sphi %s993_s12, %s1283_s12  }
   0x7   : > { %p40_p0 = scmp.ne.s32.totalorder %s953_s13, %s949_s12  ;;  %p1267_p1 = scmp.eq.s32.totalorder %s1014_s16, 0 }
   0x8   : > { %p112_p3 = scmp.eq.s32.totalorder %s619_s17, 1  ;;  %p620_p5 = scmp.ge.s32.totalorder %s961_s15, 1 }
   0x9   : > { %p1023_p4 = por %p1267_p1, %p40_p0  ;;  %p119_p7 = scmp.lt.s32.totalorder %s961_s15, 3 }
   0xa   : > { %p1028_p6 = por %p112_p3, %p40_p0  ;;  %s963_s21 = smov [#allocation5]  }
   0xb   : > { %s1270_s18 = scalar_select %p1023_p4, 1, 0 }
   0xc   : > { %s1271_s19 = scalar_select %p1028_p6, 1, 0 }
   0xd   : > { %p1033_p8 = pnand %p620_p5, %p119_p7  ;;  %s131_s22 = sshll.u32 %s963_s21, 4  ;;  %s1037_s22 = int_to_ptr.vmem [resolvable:$true] %s131_s22 }
   0xe   : > { %s1049_s24 = sadd.s32 1, %s961_s15   ;;  %s27_s25 = sadd.s32 1, %s957_s14 }
   0xf   : > { %s1272_s20 = scalar_select %p1033_p8, 1, 0 }
  0x10   : > { %p777_p9 = pneg %p1033_p8  ;;  %s24_s26 = ssub.s32 %s961_s15, %s1049_s24 }
  0x11   : > { %s833_s29 = scalar_lea.hbm %s1264_s1, 6144 }
  0x12   : > { %p1044_p11 = pnand %p777_p9, %p1267_p1  ;;  %p834_p12 = scmp.ne.s32.totalorder %s1264_s1, %s833_s29 }
  0x13   : > { %p840_p5 = scmp.lt.u32.totalorder %s833_s29, %s1264_s1 }
  0x14   : > { %p835_p13 = pneg %p1044_p11 }
  0x16   : > { %p836_p0 = pnand %p835_p13, %p834_p12 }
  0x18   : > { %p837_p3 = pneg %p836_p0 }
  0x1a   : > { %p842_p7 = pnand %p840_p5, %p837_p3 }
  0x1c   : > { %845 = shalt.err (!%p842_p7)
}
  0x1d   : > { %s846_s7 = scalar_lea.vmem %s1037_s22, 6144  ;;  %p854_p2 = scmp.lt.s32.totalorder %s1037_s22, %s1037_s22 }
  0x1e   : > { %p847_p9 = scmp.ne.s32.totalorder %s1037_s22, %s846_s7  ;;  %p855_p6 = scmp.lt.s32.totalorder %s846_s7, %s846_s7 }
  0x20   : > { %p849_p10 = pnand %p847_p9, %p835_p13  ;;  %p856_p4 = por %p855_p6, %p854_p2 }
  0x22   : > { %p850_p1 = pneg %p849_p10 }
  0x24   : > { %p857_p8 = pnand %p856_p4, %p850_p1 }
  0x26   : > { %860 = shalt.err (!%p857_p8)
}
  0x27   : > { %s964_s8 = smov 384   ;;  %s965_s9 = smov 24  }
  0x28   : > { %780 = dma.hbm_to_vmem [thread:$0]  (!%p1044_p11), %s1264_s1, 6144, %s1037_s22, [#allocation6], %s964_s8, %s964_s8, %s965_s9  }
  0x29   : > { %p25_p2 = scmp.eq.s32.totalorder %s24_s26, 0  ;;  %p34_p1 = scmp.ne.s32.totalorder %s957_s14, %s953_s13 }
  0x2a   : > { %p35_p4 = scmp.eq.s32.totalorder %s961_s15, 0  ;;  %p790_p6 = scmp.lt.s32.totalorder %s961_s15, 2 }
  0x2b   : > { %s1080_s17 = scalar_select %p25_p2, %s957_s14, %s27_s25  }
  0x2c   : > { %p36_p8 = por %p35_p4, %p34_p1  ;;  %p1274_p10 = scmp.eq.s32.totalorder %s1014_s16, 1 }
  0x2d   : > { %s148_s27 = sand.u32 1, %s957_s14   ;;  %s634_s28 = sshll.u32 %s961_s15, 10 }
  0x2e   : > { %p1084_p12 = por %p1274_p10, %p34_p1  ;;  %s623_s29 = sshll.u32 %s148_s27, 6 }
  0x2f   : > { %s1093_s4 = scalar_lea.hbm %s1263_s0, %s634_s28  ;;  %s152_s22 = scalar_lea.vmem [#allocation2], %s623_s29 }
  0x30   : > { %s159_s25 = sshll.u32 %s152_s22, 4  ;;  %p1095_p11 = pnand %p790_p6, %p36_p8  ;;  %s1099_s25 = int_to_ptr.vmem [resolvable:$true] %s159_s25 }
  0x31   : > { %s1101_s5 = scalar_lea.sflag [#allocation3], %s148_s27  ;;  %s861_s6 = scalar_lea.hbm %s1093_s4, 1024 }
  0x32   : > { %p862_p13 = scmp.ne.s32.totalorder %s1093_s4, %s861_s6  ;;  %p863_p0 = pneg %p1095_p11 }
  0x33   : > { %s866_s9 = scalar_lea.hbm %s1263_s0, 2048  ;;  %p867_p7 = scmp.lt.u32.totalorder %s1093_s4, %s1263_s0 }
  0x34   : > { %p864_p3 = pnand %p863_p0, %p862_p13  ;;  %p868_p9 = scmp.lt.u32.totalorder %s866_s9, %s861_s6 }
  0x35   : > { %p870_p1 = scmp.lt.u32.totalorder %s861_s6, %s1093_s4 }
  0x36   : > { %p865_p5 = pneg %p864_p3  ;;  %p869_p2 = por %p868_p9, %p867_p7 }
  0x38   : > { %p871_p4 = por %p870_p1, %p869_p2 }
  0x3a   : > { %p872_p6 = pnand %p871_p4, %p865_p5 }
  0x3c   : > { %875 = shalt.err (!%p872_p6)
}
  0x3d   : > { %s876_s27 = scalar_lea.vmem %s1099_s25, 1024  ;;  %s966_s28 = smov [#allocation2]  }
  0x3e   : > { %p877_p8 = scmp.ne.s32.totalorder %s1099_s25, %s876_s27  ;;  %s881_s29 = sshll.u32 %s966_s28, 4  ;;  %s882_s29 = int_to_ptr.vmem [resolvable:$false] %s881_s29 }
  0x3f   : > { %s883_s23 = scalar_lea.vmem %s882_s29, 2048  ;;  %p884_p3 = scmp.lt.s32.totalorder %s1099_s25, %s882_s29 }
  0x40   : > { %p879_p10 = pnand %p877_p8, %p863_p0  ;;  %p885_p7 = scmp.lt.s32.totalorder %s883_s23, %s876_s27 }
  0x42   : > { %p880_p13 = pneg %p879_p10  ;;  %p886_p9 = por %p885_p7, %p884_p3 }
  0x44   : > { %p887_p2 = pnand %p886_p9, %p880_p13 }
  0x46   : > { %890 = shalt.err (!%p887_p2)
}
  0x47   : > { %s967_s30 = smov 128   ;;  %s968_s22 = smov 8  }
  0x48   : > { %784 = dma.hbm_to_vmem [thread:$0]  (!%p1095_p11), %s1093_s4, 1024, %s1099_s25, %s1101_s5, %s967_s30, %s967_s30, %s968_s22  }
  0x49   : > { %p1277_p0 = scmp.ne.s32.totalorder %s1272_s20, 0 }
  0x4a   : > { %s1132_s6 = sand.u32 (!%p1277_p0), 1, %s953_s13   ;;  %p1278_p5 = scmp.ne.s32.totalorder (!%p1277_p0), %s1270_s18, 0 }
  0x4b   : > { %171 = sbr.rel (%p1277_p0) target bundleno = 379 (0x17b), region = 32  ;;  %s627_s7 = sshll.u32 (!%p1277_p0), %s1132_s6, 6 }
  0x4c   : > { %s174_s8 = scalar_lea.sflag (!%p1277_p0), [#allocation3], %s1132_s6  ;;  %s1136_s9 = scalar_lea.vmem (!%p1277_p0), [#allocation2], %s627_s7 }
  0x52   : > { %936 = dma.done.wait (%p1278_p5), %s174_s8, 1024  }
  0x53   : > { %938 = vsyncadd (%p1278_p5), %s174_s8, 4294966272  ;;  %p1279_p11 = scmp.eq.s32.totalorder %s1014_s16, 0 }
  0x55   : > { %940 = dma.done.wait (%p1279_p11), [#allocation6], 6144   ;;  %p1280_p1 = pmov %p1279_p11 }
  0x56   : > { %v969_v0 = vmov 0.0   ;;  %v215_v1 = vld [vmem:[#allocation5 + $0x8] sm:$0xff]  ;;  %v218_v2 = vld [vmem:[#allocation5 + $0x20] sm:$0xff]  ;;  %v217_v5 = vld [vmem:[#allocation5 + $0x18] sm:$0xff]  ;;  %s767_s4 = smul.u32 192, %s1132_s6  ;;  %s970_s29 = smov [#allocation7]  }
  0x57   : > { %942 = vsyncadd (%p1280_p1), [#allocation6], 4294961152  ;;  %343 = vmatprep.mubr.f32.mxu0 %v969_v0  ;;  %v214_v3 = vld [vmem:[#allocation5] sm:$0xff]  ;;  %v703_v4 = vpack.c.bf16 %v218_v2, %v215_v1  ;;  %v221_v6 = vld [vmem:[#allocation5 + $0x38] sm:$0xff]  ;;  %s768_s26 = smul.u32 3072, %s1014_s16  ;;  %s522_s16 = scalar_lea.sflag [#allocation4], %s1132_s6 }
  0x58   : > { %v224_v7 = vld [vmem:[#allocation5 + $0x50] sm:$0xff]  ;;  %v705_v8 = vpack.c.bf16 %v217_v5, %v214_v3  ;;  %v223_v11 = vld [vmem:[#allocation5 + $0x48] sm:$0xff]  ;;  %v230_v13 = vld [vmem:[#allocation5 + $0x80] sm:$0xff]  ;;  %s1172_s25 = scalar_lea.vmem [#allocation7], %s767_s4  ;;  %s895_s23 = sshll.u32 %s970_s29, 4  ;;  %s896_s23 = int_to_ptr.vmem [resolvable:$false] %s895_s23 }
  0x59   : > { %v707_v9 = vpack.c.bf16 %v224_v7, %v221_v6  ;;  %v220_v10 = vld [vmem:[#allocation5 + $0x30] sm:$0xff]  ;;  %v227_v12 = vld [vmem:[#allocation5 + $0x68] sm:$0xff]  ;;  %704 = vmatprep.subr.bf16.mxu0 %v703_v4  ;;  %v226_v15 = vld [vmem:[#allocation5 + $0x60] sm:$0xff]  ;;  %s536_s5 = sshll.u32 %s1172_s25, 4  ;;  %s1214_s27 = scalar_lea.hbm %s1266_s3, %s768_s26  ;;  %s1216_s5 = int_to_ptr.vmem [resolvable:$true] %s536_s5 }
  0x5a   : > { %706 = vmatpush1.bf16.msra.mxu0 %v705_v8  ;;  %v709_v14 = vpack.c.bf16 %v223_v11, %v220_v10  ;;  %v711_v16 = vpack.c.bf16 %v230_v13, %v227_v12  ;;  %v229_v17 = vld [vmem:[#allocation5 + $0x78] sm:$0xff]  ;;  %v216_v18 = vld [vmem:[#allocation5 + $0x10] sm:$0xff]  ;;  %v219_v19 = vld [vmem:[#allocation5 + $0x28] sm:$0xff]  ;;  %s891_s28 = scalar_lea.vmem %s1216_s5, 3072  ;;  %s897_s30 = scalar_lea.vmem %s896_s23, 6144 }
  0x5b   : > { %708 = vmatprep.subr.bf16.mxu0 %v707_v9  ;;  %v233_v20 = vld [vmem:[#allocation5 + $0x98] sm:$0xff]  ;;  %v236_v21 = vld [vmem:[#allocation5 + $0xb0] sm:$0xff]  ;;  %v735_v22 = vpack.c.bf16 %v219_v19, %v216_v18  ;;  %v222_v23 = vld [vmem:[#allocation5 + $0x40] sm:$0xff]  ;;  %v713_v25 = vpack.c.bf16 %v229_v17, %v226_v15  ;;  %v264_v18 = vlaneseq  ;;  %p892_p4 = scmp.ne.s32.totalorder %s1216_s5, %s891_s28  ;;  %p898_p10 = scmp.lt.s32.totalorder %s1216_s5, %s896_s23 }
  0x5c   : > { %v225_v24 = vld [vmem:[#allocation5 + $0x58] sm:$0xff]  ;;  %v232_v26 = vld [vmem:[#allocation5 + $0x90] sm:$0xff]  ;;  %v715_v28 = vpack.c.bf16 %v236_v21, %v233_v20  ;;  %v235_v29 = vld [vmem:[#allocation5 + $0xa8] sm:$0xff]  ;;  %p899_p13 = scmp.lt.s32.totalorder %s897_s30, %s891_s28 }
  0x5d   : > { %736 = vmatprep.subr.bf16.mxu1 %v735_v22  ;;  %v739_v27 = vpack.c.bf16 %v225_v24, %v222_v23  ;;  %v228_v30 = vld [vmem:[#allocation5 + $0x70] sm:$0xff]  ;;  %v231_v31 = vld [vmem:[#allocation5 + $0x88] sm:$0xff]  ;;  %v242_v33 = vld [vmem:[#allocation5 + $0xe0] sm:$0xff]  ;;  %v717_v37 = vpack.c.bf16 %v235_v29, %v232_v26  ;;  %v265_v19 = vshrl.u32 %v264_v18, 7  ;;  %p893_p6 = pnand %p892_p4, %p1084_p12 }
  0x5e   : > { %710 = vmatpush1.bf16.msra.mxu0 %v709_v14  ;;  %738 = vmatpush3.bf16.msra.mxu1 %v735_v22  ;;  %v239_v32 = vld [vmem:[#allocation5 + $0xc8] sm:$0xff]  ;;  %v743_v34 = vpack.c.bf16 %v231_v31, %v228_v30  ;;  %v234_v35 = vld [vmem:[#allocation5 + $0xa0] sm:$0xff]  ;;  %v237_v36 = vld [vmem:[#allocation5 + $0xb8] sm:$0xff]  ;;  %p900_p3 = por %p899_p13, %p898_p10 }
  0x5f   : > { %712 = vmatprep.subr.bf16.mxu0 %v711_v16  ;;  %740 = vmatprep.subr.bf16.mxu1 %v739_v27  ;;  %v719_v38 = vpack.c.bf16 %v242_v33, %v239_v32  ;;  %v238_v39 = vld [vmem:[#allocation5 + $0xc0] sm:$0xff]  ;;  %v241_v40 = vld [vmem:[#allocation5 + $0xd8] sm:$0xff]  ;;  %v248_v42 = vld [vmem:[#allocation5 + $0x110] sm:$0xff]  ;;  %v747_v43 = vpack.c.bf16 %v237_v36, %v234_v35  ;;  %v266_v20 = vsub.s32 0, %v265_v19  ;;  %v270_v22 = vsub.s32 1, %v265_v19  ;;  %p894_p8 = pneg %p893_p6 }
  0x60   : > { %v245_v41 = vld [vmem:[#allocation5 + $0xf8] sm:$0xff]  ;;  %v206_v44 = vld [vmem:[%s1136_s9] sm:$0xff]  ;;  %v240_v45 = vld [vmem:[#allocation5 + $0xd0] sm:$0xff]  ;;  %v721_v47 = vpack.c.bf16 %v241_v40, %v238_v39 }
  0x61   : > { %v243_v46 = vld [vmem:[#allocation5 + $0xe8] sm:$0xff]  ;;  %691 = vmatprep.mubr.f32.mxu1 %v206_v44  ;;  %v723_v48 = vpack.c.bf16 %v248_v42, %v245_v41  ;;  %v244_v49 = vld [vmem:[#allocation5 + $0xf0] sm:$0xff]  ;;  %v254_v52 = vld [vmem:[#allocation5 + $0x140] sm:$0xff]  ;;  %p901_p7 = pnand %p900_p3, %p894_p8 }
  0x62   : > { %714 = vmatpush1.bf16.msra.mxu0 %v713_v25  ;;  %742 = vmatpush3.bf16.msra.mxu1 %v739_v27  ;;  %v247_v50 = vld [vmem:[#allocation5 + $0x108] sm:$0xff]  ;;  %v751_v53 = vpack.c.bf16 %v243_v46, %v240_v45  ;;  %v246_v54 = vld [vmem:[#allocation5 + $0x100] sm:$0xff]  ;;  %v249_v55 = vld [vmem:[#allocation5 + $0x118] sm:$0xff]  ;;  %v274_v25 = vsub.s32 2, %v265_v19 }
  0x63   : > { %716 = vmatprep.subr.bf16.mxu0 %v715_v28  ;;  %744 = vmatprep.subr.bf16.mxu1 %v743_v34  ;;  %v251_v51 = vld [vmem:[#allocation5 + $0x128] sm:$0xff]  ;;  %v725_v56 = vpack.c.bf16 %v247_v50, %v244_v49  ;;  %v250_v58 = vld [vmem:[#allocation5 + $0x120] sm:$0xff]  ;;  %v253_v59 = vld [vmem:[#allocation5 + $0x138] sm:$0xff]  ;;  %v755_v62 = vpack.c.bf16 %v249_v55, %v246_v54 }
  0x64   : > { %v727_v57 = vpack.c.bf16 %v254_v52, %v251_v51  ;;  %v257_v60 = vld [vmem:[#allocation5 + $0x158] sm:$0xff]  ;;  %v260_v61 = vld [vmem:[#allocation5 + $0x170] sm:$0xff]  ;;  %v255_v1 = vld [vmem:[#allocation5 + $0x148] sm:$0xff]  ;;  %v729_v2 = vpack.c.bf16 %v253_v59, %v250_v58 }
  0x65   : > { %v252_v63 = vld [vmem:[#allocation5 + $0x130] sm:$0xff]  ;;  %v731_v3 = vpack.c.bf16 %v260_v61, %v257_v60  ;;  %v259_v5 = vld [vmem:[#allocation5 + $0x168] sm:$0xff]  ;;  %v258_v7 = vld [vmem:[#allocation5 + $0x160] sm:$0xff] }
  0x66   : > { %718 = vmatpush1.bf16.msra.mxu0 %v717_v37  ;;  %746 = vmatpush3.bf16.msra.mxu1 %v743_v34  ;;  %v256_v4 = vld [vmem:[#allocation5 + $0x150] sm:$0xff]  ;;  %v759_v6 = vpack.c.bf16 %v255_v1, %v252_v63  ;;  %v261_v8 = vld [vmem:[#allocation5 + $0x178] sm:$0xff]  ;;  %v207_v11 = vld [vmem:[%s1136_s9 + $0x8] sm:$0xff] }
  0x67   : > { %720 = vmatprep.subr.bf16.mxu0 %v719_v38  ;;  %748 = vmatprep.subr.bf16.mxu1 %v747_v43  ;;  %v733_v9 = vpack.c.bf16 %v259_v5, %v256_v4  ;;  %v763_v10 = vpack.c.bf16 %v261_v8, %v258_v7  ;;  %v208_v12 = vld [vmem:[%s1136_s9 + $0x10] sm:$0xff]  ;;  %v209_v13 = vld [vmem:[%s1136_s9 + $0x18] sm:$0xff]  ;;  %v210_v14 = vld [vmem:[%s1136_s9 + $0x20] sm:$0xff] }
  0x68   : > { %v211_v15 = vld [vmem:[%s1136_s9 + $0x28] sm:$0xff]  ;;  %v212_v16 = vld [vmem:[%s1136_s9 + $0x30] sm:$0xff]  ;;  %v213_v17 = vld [vmem:[%s1136_s9 + $0x38] sm:$0xff] }
  0x69   : > { %v262_v21 = vld [vmem:[%s1265_s2] sm:$0x7] }
  0x6a   : > { %722 = vmatpush1.bf16.msra.mxu0 %v721_v47  ;;  %750 = vmatpush3.bf16.msra.mxu1 %v747_v43  ;;  %v1166_v23 = vrot.slane %v262_v21, %v266_v20  ;;  %v1168_v24 = vrot.slane %v262_v21, %v270_v22  ;;  %v275_v29 = vrot.slane %v262_v21, %v274_v25 }
  0x6b   : > { %724 = vmatprep.subr.bf16.mxu0 %v723_v48  ;;  %752 = vmatprep.subr.bf16.mxu1 %v751_v53 }
  0x6e   : > { %726 = vmatpush1.bf16.msra.mxu0 %v725_v56  ;;  %754 = vmatpush3.bf16.msra.mxu1 %v751_v53 }
  0x6f   : > { %728 = vmatprep.subr.bf16.mxu0 %v727_v57  ;;  %756 = vmatprep.subr.bf16.mxu1 %v755_v62 }
  0x72   : > { %730 = vmatpush1.bf16.msra.mxu0 %v729_v2  ;;  %758 = vmatpush3.bf16.msra.mxu1 %v755_v62 }
  0x73   : > { %732 = vmatprep.subr.bf16.mxu0 %v731_v3  ;;  %760 = vmatprep.subr.bf16.mxu1 %v759_v6 }
  0x76   : > { %734 = vmatpush1.bf16.msra.mxu0 %v733_v9  ;;  %762 = vmatpush3.bf16.msra.mxu1 %v759_v6 }
  0x77   : > { %764 = vmatprep.subr.bf16.mxu1 %v763_v10 }
  0x79   : > { %344 = vmatmul.mubr.f32.vlgmr.msra.gmra.mrb[0].mxu0 %v206_v44 }
  0x7a   : > { %349 = vmatprep.mubr.f32.mxu0 %v969_v0  ;;  %766 = vmatpush3.bf16.msra.mxu1 %v763_v10 }
  0x7d   : > { %350 = vmatmul.mubr.f32.gmra.mrb[2].mxu0 %v207_v11  ;;  %692 = vmatmul.mubr.f32.vlgmr.msra.gmra.mrb[0].mxu1 %v207_v11 }
  0x7e   : > { %355 = vmatprep.mubr.f32.mxu0 %v969_v0  ;;  %694 = vmatprep.mubr.f32.mxu1 %v208_v12 }
  0x81   : > { %356 = vmatmul.mubr.f32.gmra.mrb[4].mxu0 %v208_v12  ;;  %695 = vmatmul.mubr.f32.gmra.mrb[2].mxu1 %v209_v13 }
  0x82   : > { %361 = vmatprep.mubr.f32.mxu0 %v969_v0  ;;  %697 = vmatprep.mubr.f32.mxu1 %v210_v14 }
  0x85   : > { %362 = vmatmul.mubr.f32.gmra.mrb[6].mxu0 %v209_v13  ;;  %698 = vmatmul.mubr.f32.gmra.mrb[4].mxu1 %v211_v15 }
  0x86   : > { %367 = vmatprep.mubr.f32.mxu0 %v969_v0  ;;  %700 = vmatprep.mubr.f32.mxu1 %v212_v16 }
  0x89   : > { %368 = vmatmul.mubr.f32.gmra.mrb[8].mxu0 %v210_v14  ;;  %701 = vmatmul.mubr.f32.gmra.mrb[6].mxu1 %v213_v17 }
  0x8a   : > { %373 = vmatprep.mubr.f32.mxu0 %v969_v0 }
  0x8d   : > { %374 = vmatmul.mubr.f32.gmra.mrb[10].mxu0 %v211_v15 }
  0x8e   : > { %379 = vmatprep.mubr.f32.mxu0 %v969_v0 }
  0x91   : > { %380 = vmatmul.mubr.f32.gmra.mrb[12].mxu0 %v212_v16 }
  0x92   : > { %385 = vmatprep.mubr.f32.mxu0 %v969_v0 }
  0x95   : > { %386 = vmatmul.mubr.f32.gmra.mrb[14].mxu0 %v213_v17 }
 0x14c   : > { %v345_v26 = vpop.f32.mrb[0].mxu0 }
 0x14d   : > { %v346_v27 = vadd.f32 %v345_v26, %v1166_v23  ;;  %v347_v28 = vpop.f32.mrb[1].mxu0 }
 0x14e   : > { %v348_v0 = vadd.f32 %v347_v28, %v1168_v24 }
 0x14f   : > { %497 = vst [vmem:[%s1172_s25] sm:$0xff] %v346_v27 }
 0x150   : > { %498 = vst [vmem:[%s1172_s25 + $0x8] sm:$0xff] %v348_v0  ;;  %v351_v30 = vpop.f32.mrb[2].mxu0  ;;  %v693_v33 = vpop.f32.mrb[0].mxu1 }
 0x151   : > { %v352_v31 = vadd.f32 %v351_v30, %v1166_v23  ;;  %v353_v32 = vpop.f32.mrb[3].mxu0  ;;  %v464_v35 = vadd.f32 %v693_v33, %v275_v29  ;;  %v458_v36 = vpop.f32.mrb[1].mxu1 }
 0x152   : > { %v354_v34 = vadd.f32 %v353_v32, %v1168_v24  ;;  %v459_v37 = vadd.f32 %v458_v36, %v275_v29 }
 0x153   : > { %500 = vst [vmem:[%s1172_s25 + $0x18] sm:$0xff] %v352_v31  ;;  %502 = vst [vmem:[%s1172_s25 + $0x28] sm:$0xff] %v464_v35 }
 0x154   : > { %501 = vst [vmem:[%s1172_s25 + $0x20] sm:$0xff] %v354_v34  ;;  %v357_v38 = vpop.f32.mrb[4].mxu0  ;;  %499 = vst [vmem:[%s1172_s25 + $0x10] sm:$0xff] %v459_v37  ;;  %v696_v41 = vpop.f32.mrb[2].mxu1 }
 0x155   : > { %v358_v39 = vadd.f32 %v357_v38, %v1166_v23  ;;  %v359_v40 = vpop.f32.mrb[5].mxu0  ;;  %v474_v43 = vadd.f32 %v696_v41, %v275_v29  ;;  %v468_v44 = vpop.f32.mrb[3].mxu1 }
 0x156   : > { %v360_v42 = vadd.f32 %v359_v40, %v1168_v24  ;;  %v469_v45 = vadd.f32 %v468_v44, %v275_v29 }
 0x157   : > { %503 = vst [vmem:[%s1172_s25 + $0x30] sm:$0xff] %v358_v39  ;;  %508 = vst [vmem:[%s1172_s25 + $0x58] sm:$0xff] %v474_v43 }
 0x158   : > { %504 = vst [vmem:[%s1172_s25 + $0x38] sm:$0xff] %v360_v42  ;;  %v363_v46 = vpop.f32.mrb[6].mxu0  ;;  %505 = vst [vmem:[%s1172_s25 + $0x40] sm:$0xff] %v469_v45  ;;  %v699_v49 = vpop.f32.mrb[4].mxu1 }
 0x159   : > { %v364_v47 = vadd.f32 %v363_v46, %v1166_v23  ;;  %v365_v48 = vpop.f32.mrb[7].mxu0  ;;  %v484_v51 = vadd.f32 %v699_v49, %v275_v29  ;;  %v478_v52 = vpop.f32.mrb[5].mxu1 }
 0x15a   : > { %v366_v50 = vadd.f32 %v365_v48, %v1168_v24  ;;  %v479_v53 = vadd.f32 %v478_v52, %v275_v29 }
 0x15b   : > { %506 = vst [vmem:[%s1172_s25 + $0x48] sm:$0xff] %v364_v47  ;;  %514 = vst [vmem:[%s1172_s25 + $0x88] sm:$0xff] %v484_v51 }
 0x15c   : > { %507 = vst [vmem:[%s1172_s25 + $0x50] sm:$0xff] %v366_v50  ;;  %v369_v54 = vpop.f32.mrb[8].mxu0  ;;  %511 = vst [vmem:[%s1172_s25 + $0x70] sm:$0xff] %v479_v53  ;;  %v702_v57 = vpop.f32.mrb[6].mxu1 }
 0x15d   : > { %v370_v55 = vadd.f32 %v369_v54, %v1166_v23  ;;  %v371_v56 = vpop.f32.mrb[9].mxu0  ;;  %v494_v59 = vadd.f32 %v702_v57, %v275_v29  ;;  %v488_v60 = vpop.f32.mrb[7].mxu1 }
 0x15e   : > { %v372_v58 = vadd.f32 %v371_v56, %v1168_v24  ;;  %v489_v61 = vadd.f32 %v488_v60, %v275_v29 }
 0x15f   : > { %509 = vst [vmem:[%s1172_s25 + $0x60] sm:$0xff] %v370_v55  ;;  %520 = vst [vmem:[%s1172_s25 + $0xb8] sm:$0xff] %v494_v59 }
 0x160   : > { %510 = vst [vmem:[%s1172_s25 + $0x68] sm:$0xff] %v372_v58  ;;  %v375_v62 = vpop.f32.mrb[10].mxu0  ;;  %517 = vst [vmem:[%s1172_s25 + $0xa0] sm:$0xff] %v489_v61 }
 0x161   : > { %v376_v63 = vadd.f32 %v375_v62, %v1166_v23  ;;  %v377_v1 = vpop.f32.mrb[11].mxu0 }
 0x162   : > { %v378_v2 = vadd.f32 %v377_v1, %v1168_v24 }
 0x163   : > { %512 = vst [vmem:[%s1172_s25 + $0x78] sm:$0xff] %v376_v63 }
 0x164   : > { %513 = vst [vmem:[%s1172_s25 + $0x80] sm:$0xff] %v378_v2  ;;  %v381_v3 = vpop.f32.mrb[12].mxu0 }
 0x165   : > { %v382_v4 = vadd.f32 %v381_v3, %v1166_v23  ;;  %v383_v5 = vpop.f32.mrb[13].mxu0 }
 0x166   : > { %v384_v6 = vadd.f32 %v383_v5, %v1168_v24 }
 0x167   : > { %515 = vst [vmem:[%s1172_s25 + $0x90] sm:$0xff] %v382_v4 }
 0x168   : > { %516 = vst [vmem:[%s1172_s25 + $0x98] sm:$0xff] %v384_v6  ;;  %v387_v7 = vpop.f32.mrb[14].mxu0 }
 0x169   : > { %v388_v8 = vadd.f32 %v387_v7, %v1166_v23  ;;  %v389_v9 = vpop.f32.mrb[15].mxu0 }
 0x16a   : > { %v390_v10 = vadd.f32 %v389_v9, %v1168_v24 }
 0x16b   : > { %518 = vst [vmem:[%s1172_s25 + $0xa8] sm:$0xff] %v388_v8 }
 0x16c   : > { %519 = vst [vmem:[%s1172_s25 + $0xb0] sm:$0xff] %v390_v10 }
 0x16d   : > { %904 = shalt.err (!%p901_p7)
}
 0x16e   : > { %s905_s22 = scalar_lea.hbm %s1214_s27, 3072  ;;  %s909_s9 = scalar_lea.hbm %s1266_s3, 6144 }
 0x16f   : > { %p906_p9 = scmp.ne.s32.totalorder %s1214_s27, %s905_s22  ;;  %p910_p5 = scmp.lt.u32.totalorder %s1214_s27, %s1266_s3 }
 0x170   : > { %p911_p11 = scmp.lt.u32.totalorder %s909_s9, %s905_s22  ;;  %p913_p4 = scmp.lt.u32.totalorder %s905_s22, %s1214_s27 }
 0x171   : > { %p907_p2 = pnand %p906_p9, %p1084_p12 }
 0x172   : > { %p912_p1 = por %p911_p11, %p910_p5 }
 0x173   : > { %p908_p0 = pneg %p907_p2 }
 0x174   : > { %p914_p6 = por %p913_p4, %p912_p1 }
 0x176   : > { %p915_p8 = pnand %p914_p6, %p908_p0 }
 0x178   : > { %918 = shalt.err (!%p915_p8)
}
 0x179   : > { %s971_s4 = smov 384   ;;  %s972_s25 = smov 24  }
 0x17a   : > { %775 = dma.vmem_to_hbm [thread:$0]  (%p1084_p12), %s1216_s5, 3072, %s1214_s27, %s522_s16, %s971_s4, %s971_s4, %s972_s25  }
 0x17b PF: > { %s551_s26 = sand.u32 1, %s949_s12   ;;  %p1281_p10 = scmp.ne.s32.totalorder %s1271_s19, 0 }
 0x17c   : > { %p1282_p13 = scmp.ge.s32.totalorder %s961_s15, 2  ;;  %s552_s10 = scalar_lea.sflag [#allocation4], %s551_s26 }
 0x17e   : > { %p786_p3 = pnand %p1282_p13, %p1281_p10 }
 0x180   : > { %944 = dma.done.wait (!%p786_p3), %s552_s10, 3072  }
 0x181   : > { %946 = vsyncadd (!%p786_p3), %s552_s10, 4294964224  ;;  %p17_p7 = scmp.ge.s32.totalorder %s1049_s24, 4   ;;  %s1283_s12 = smov %s953_s13 }
 0x182   : > { %s1284_s13 = smov %s957_s14  ;;  %s1285_s14 = smov %s1080_s17 }
 0x183   : > { %s1286_s15 = smov %s1049_s24  ;;  %19 = sbr.rel (!%p17_p7) target bundleno = 6 (0x6), region = 81 }
 0x18a   :  { %557 = vsyncpa [#allocation3], 1 }
 0x18b   :  { %559 = vsyncpa [#allocation3 + $0x1], 1 }
 0x18c   :  { %560 = vsyncpa [#allocation6], 1 }
 0x18d   :  { %561 = vsyncpa [#allocation4], 1 }
 0x18e   :  { %563 = vsyncpa [#allocation4 + $0x1], 1 }

</bundles_post_ra>
